<compile_context>
chip_gen: v5e
topology: v5e:2x2
jax: 0.10.0
libtpu: 0.0.40
codegen_flags: <defaults>
</compile_context>

<pallas_src>
import math

import jax
import jax.numpy as jnp
import numpy as np
from jax.experimental import pallas as pl
from jax.experimental.pallas import tpu as pltpu


def ssm_kernel(x_ref,
               bre_t_ref, bim_t_ref, cre_t_ref, cim_t_ref, d_t_ref,
               lre_ref, lim_ref, gam_ref,
               w1_t_ref, w2_t_ref, w3_t_ref, wlin_t_ref,
               out_ref,
               h_re_ref, h_im_ref, st_re_ref, st_im_ref):
    chunk = pl.program_id(0)

    @pl.when(chunk == 0)
    def _init_state():
        h_re_ref[...] = jnp.zeros_like(h_re_ref)
        h_im_ref[...] = jnp.zeros_like(h_im_ref)

    Bn, Tc, IN = x_ref.shape
    S = h_re_ref.shape[-1]
    OUT = out_ref.shape[-1]

    x_chunk = x_ref[...]                               # (Bn, Tc, IN)
    xf = x_chunk.reshape(Bn * Tc, IN)                  # batch-major rows

    # ---- hoisted chunk-wide input projection:  gamma * (u @ B^T) ----------
    gam = gam_ref[...]                                 # (1, S)
    gbu_re = gam * jnp.dot(xf, bre_t_ref[...], preferred_element_type=jnp.float32)
    gbu_im = gam * jnp.dot(xf, bim_t_ref[...], preferred_element_type=jnp.float32)
    st_re_ref[...] = gbu_re.reshape(Bn, Tc, S)
    st_im_ref[...] = gbu_im.reshape(Bn, Tc, S)

    # ---- sequential complex recurrence (elementwise only) -----------------
    lam_re = jnp.broadcast_to(lre_ref[...], (Bn, S))   # hoisted broadcasts
    lam_im = jnp.broadcast_to(lim_ref[...], (Bn, S))

    def step(t, carry):
        h_re, h_im = carry                             # (Bn, S) in vregs
        gb_re = st_re_ref[:, pl.ds(t, 1), :].reshape(Bn, S)
        gb_im = st_im_ref[:, pl.ds(t, 1), :].reshape(Bn, S)
        n_re = lam_re * h_re - lam_im * h_im + gb_re
        n_im = lam_re * h_im + lam_im * h_re + gb_im
        # overwrite the consumed gamma*Bu slot with h_t (read back after loop)
        st_re_ref[:, pl.ds(t, 1), :] = n_re.reshape(Bn, 1, S)
        st_im_ref[:, pl.ds(t, 1), :] = n_im.reshape(Bn, 1, S)
        return n_re, n_im

    h0 = (h_re_ref[...], h_im_ref[...])
    h_re, h_im = jax.lax.fori_loop(0, Tc, step, h0, unroll=Tc <= 64)
    h_re_ref[...] = h_re                               # carry to next chunk
    h_im_ref[...] = h_im

    # ---- hoisted chunk-wide output path ------------------------------------
    hs_re = st_re_ref[...].reshape(Bn * Tc, S)         # all h_t of this chunk
    hs_im = st_im_ref[...].reshape(Bn * Tc, S)

    cx_re = (jnp.dot(hs_re, cre_t_ref[...], preferred_element_type=jnp.float32)
             - jnp.dot(hs_im, cim_t_ref[...], preferred_element_type=jnp.float32))
    du = jnp.dot(xf, d_t_ref[...], preferred_element_type=jnp.float32)
    y_lru = 2.0 * cx_re + du                           # (Bn*Tc, OUT)

    # MLP: Linear -> SiLU -> Linear -> ReLU -> Linear (bias-free)
    z1 = jnp.dot(y_lru, w1_t_ref[...], preferred_element_type=jnp.float32)
    z1 = z1 * jax.nn.sigmoid(z1)
    z2 = jnp.maximum(jnp.dot(z1, w2_t_ref[...], preferred_element_type=jnp.float32), 0.0)
    z3 = jnp.dot(z2, w3_t_ref[...], preferred_element_type=jnp.float32)

    skip = jnp.dot(xf, wlin_t_ref[...], preferred_element_type=jnp.float32)

    out_ref[...] = (z3 + skip).reshape(Bn, Tc, OUT)    # one lane-slab per chunk


def init_params(key, in_features, out_features, state_features, hidden,
                rmin=0.9, rmax=1.0, max_phase=6.283):
    ks = jax.random.split(key, 11)
    D = jax.random.normal(ks[0], (out_features, in_features), jnp.float32) / math.sqrt(in_features)
    u1 = jax.random.uniform(ks[1], (state_features,), jnp.float32)
    u2 = jax.random.uniform(ks[2], (state_features,), jnp.float32)
    nu_log = jnp.log(-0.5 * jnp.log(u1 * (rmax + rmin) * (rmax - rmin) + rmin ** 2))
    theta_log = jnp.log(max_phase * u2)
    lam_mod = jnp.exp(-jnp.exp(nu_log))
    gamma_log = jnp.log(jnp.sqrt(1.0 - lam_mod ** 2))
    B_re = jax.random.normal(ks[3], (state_features, in_features), jnp.float32) / math.sqrt(2 * in_features)
    B_im = jax.random.normal(ks[4], (state_features, in_features), jnp.float32) / math.sqrt(2 * in_features)
    C_re = jax.random.normal(ks[5], (out_features, state_features), jnp.float32) / math.sqrt(state_features)
    C_im = jax.random.normal(ks[6], (out_features, state_features), jnp.float32) / math.sqrt(state_features)
    W1 = jax.random.normal(ks[7], (hidden, out_features), jnp.float32) / math.sqrt(out_features)
    W2 = jax.random.normal(ks[8], (hidden, hidden), jnp.float32) / math.sqrt(hidden)
    W3 = jax.random.normal(ks[9], (out_features, hidden), jnp.float32) / math.sqrt(hidden)
    Wlin = jax.random.normal(ks[10], (out_features, in_features), jnp.float32) / math.sqrt(in_features)

    lam_re = lam_mod * jnp.cos(jnp.exp(theta_log))
    lam_im = lam_mod * jnp.sin(jnp.exp(theta_log))
    gamma = jnp.exp(gamma_log)
    return dict(D=D, B_re=B_re, B_im=B_im, C_re=C_re, C_im=C_im,
                lam_re=lam_re, lam_im=lam_im, gamma=gamma,
                W1=W1, W2=W2, W3=W3, Wlin=Wlin)


def ssm_forward(x, p, chunk=128):
    """x: (B, T, IN) float32 -> (B, T, OUT) float32."""
    Bn, T, IN = x.shape
    OUT = p["D"].shape[0]
    S = p["B_re"].shape[0]

    # time-chunk length: a multiple of 8 sublanes, capped at `chunk`
    Tc = min(chunk, ((T + 7) // 8) * 8)
    T_pad = ((T + Tc - 1) // Tc) * Tc
    if T_pad != T:
        # zero-padded tail timesteps never influence earlier outputs
        x = jnp.pad(x, ((0, 0), (0, T_pad - T), (0, 0)))
    n_chunks = T_pad // Tc

    weights = [
        p["B_re"].T,                                  # (IN, S)
        p["B_im"].T,                                  # (IN, S)
        p["C_re"].T,                                  # (S, OUT)
        p["C_im"].T,                                  # (S, OUT)
        p["D"].T,                                     # (IN, OUT)
        p["lam_re"].reshape(1, S),
        p["lam_im"].reshape(1, S),
        p["gamma"].reshape(1, S),
        p["W1"].T,                                    # (OUT, H)
        p["W2"].T,                                    # (H, H)
        p["W3"].T,                                    # (H, OUT)
        p["Wlin"].T,                                  # (IN, OUT)
    ]

    def wspec(arr):
        # resident weight: block index constant across the grid
        return pl.BlockSpec(arr.shape, lambda c: (0,) * arr.ndim)

    grid_spec = pltpu.PrefetchScalarGridSpec(
        num_scalar_prefetch=0,
        grid=(n_chunks,),
        in_specs=[pl.BlockSpec((Bn, Tc, IN), lambda c: (0, c, 0))]
                 + [wspec(w) for w in weights],
        out_specs=pl.BlockSpec((Bn, Tc, OUT), lambda c: (0, c, 0)),
        scratch_shapes=[pltpu.VMEM((Bn, S), jnp.float32),        # h_re carry
                        pltpu.VMEM((Bn, S), jnp.float32),        # h_im carry
                        pltpu.VMEM((Bn, Tc, S), jnp.float32),    # gamma*Bu / h states (re)
                        pltpu.VMEM((Bn, Tc, S), jnp.float32)],   # gamma*Bu / h states (im)
    )

    out = pl.pallas_call(
        ssm_kernel,
        out_shape=jax.ShapeDtypeStruct((Bn, T_pad, OUT), jnp.float32),
        grid_spec=grid_spec,
        compiler_params=pltpu.CompilerParams(
            dimension_semantics=("arbitrary",)),       # state carried across chunks
    )(x, *weights)

    return out[:, :T, :]


def ssm_reference(x, p):
    """Pure-JAX reference (sequential scan, complex arithmetic)."""
    Bn, T, IN = x.shape
    lam = (p["lam_re"] + 1j * p["lam_im"]).astype(jnp.complex64)   # (S,)
    gam = p["gamma"]                                               # (S,)
    Bc = (p["B_re"] + 1j * p["B_im"]).astype(jnp.complex64)        # (S, IN)
    Cc = (p["C_re"] + 1j * p["C_im"]).astype(jnp.complex64)        # (OUT, S)

    def step(h, u_t):                                  # h: (B, S) complex
        bu = u_t.astype(jnp.complex64) @ Bc.T
        h = lam[None, :] * h + gam[None, :].astype(jnp.complex64) * bu
        y = 2.0 * jnp.real(h @ Cc.T) + u_t @ p["D"].T
        return h, y

    h0 = jnp.zeros((Bn, lam.shape[0]), jnp.complex64)
    _, ys = jax.lax.scan(step, h0, jnp.transpose(x, (1, 0, 2)))
    y_lru = jnp.transpose(ys, (1, 0, 2))               # (B, T, OUT)

    z = y_lru @ p["W1"].T
    z = z * jax.nn.sigmoid(z)
    z = jnp.maximum(z @ p["W2"].T, 0.0)
    z = z @ p["W3"].T
    return z + x @ p["Wlin"].T


if __name__ == "__main__":
    # small shapes consistent with the module's forward (batch, seq, in_features)
    B, T = 2, 8
    IN_FEATURES, OUT_FEATURES, STATE_FEATURES, MLP_HIDDEN = 4, 4, 32, 30

    key = jax.random.PRNGKey(0)
    kx, kp = jax.random.split(key)
    x = jax.random.normal(kx, (B, T, IN_FEATURES), jnp.float32)
    params = init_params(kp, IN_FEATURES, OUT_FEATURES, STATE_FEATURES, MLP_HIDDEN)

    out = jax.block_until_ready(jax.jit(ssm_forward)(x, params))
    ref = jax.block_until_ready(jax.jit(ssm_reference)(x, params))

    # both kernel and reference use the default TPU matmul precision
    np.testing.assert_allclose(np.asarray(out), np.asarray(ref), rtol=1e-2, atol=1e-2)
    assert out.shape == (B, T, OUT_FEATURES)
    print("KERNEL_OK")
</pallas_src>

<mosaic_0001>
module attributes {stable_mosaic.version = 11 : i64} {
  func.func @ssm_kernel(%arg0: i32, %arg1: memref<2x8x4xf32, #tpu.memory_space<vmem>>, %arg2: memref<4x32xf32, #tpu.memory_space<vmem>>, %arg3: memref<4x32xf32, #tpu.memory_space<vmem>>, %arg4: memref<32x4xf32, #tpu.memory_space<vmem>>, %arg5: memref<32x4xf32, #tpu.memory_space<vmem>>, %arg6: memref<4x4xf32, #tpu.memory_space<vmem>>, %arg7: memref<1x32xf32, #tpu.memory_space<vmem>>, %arg8: memref<1x32xf32, #tpu.memory_space<vmem>>, %arg9: memref<1x32xf32, #tpu.memory_space<vmem>>, %arg10: memref<4x30xf32, #tpu.memory_space<vmem>>, %arg11: memref<30x30xf32, #tpu.memory_space<vmem>>, %arg12: memref<30x4xf32, #tpu.memory_space<vmem>>, %arg13: memref<4x4xf32, #tpu.memory_space<vmem>>, %arg14: memref<2x8x4xf32, #tpu.memory_space<vmem>>, %arg15: memref<2x32xf32, #tpu.memory_space<vmem>>, %arg16: memref<2x32xf32, #tpu.memory_space<vmem>>, %arg17: memref<2x8x32xf32, #tpu.memory_space<vmem>>, %arg18: memref<2x8x32xf32, #tpu.memory_space<vmem>>) attributes {dimension_semantics = [#tpu.dimension_semantics<arbitrary>], iteration_bounds = array<i64: 1>, scalar_prefetch = 0 : i64, scratch_operands = 4 : i64, tpu.core_type = #tpu.core_type<tc>, window_params = [{transform_indices = @transform_0, window_bounds = array<i64: 2, 8, 4>}, {pipeline_mode = #tpu.pipeline_mode<synchronous>, transform_indices = @transform_1, window_bounds = array<i64: 4, 32>}, {pipeline_mode = #tpu.pipeline_mode<synchronous>, transform_indices = @transform_2, window_bounds = array<i64: 4, 32>}, {pipeline_mode = #tpu.pipeline_mode<synchronous>, transform_indices = @transform_3, window_bounds = array<i64: 32, 4>}, {pipeline_mode = #tpu.pipeline_mode<synchronous>, transform_indices = @transform_4, window_bounds = array<i64: 32, 4>}, {pipeline_mode = #tpu.pipeline_mode<synchronous>, transform_indices = @transform_5, window_bounds = array<i64: 4, 4>}, {pipeline_mode = #tpu.pipeline_mode<synchronous>, transform_indices = @transform_6, window_bounds = array<i64: 1, 32>}, {pipeline_mode = #tpu.pipeline_mode<synchronous>, transform_indices = @transform_7, window_bounds = array<i64: 1, 32>}, {pipeline_mode = #tpu.pipeline_mode<synchronous>, transform_indices = @transform_8, window_bounds = array<i64: 1, 32>}, {pipeline_mode = #tpu.pipeline_mode<synchronous>, transform_indices = @transform_9, window_bounds = array<i64: 4, 30>}, {pipeline_mode = #tpu.pipeline_mode<synchronous>, transform_indices = @transform_10, window_bounds = array<i64: 30, 30>}, {pipeline_mode = #tpu.pipeline_mode<synchronous>, transform_indices = @transform_11, window_bounds = array<i64: 30, 4>}, {pipeline_mode = #tpu.pipeline_mode<synchronous>, transform_indices = @transform_12, window_bounds = array<i64: 4, 4>}, {transform_indices = @transform_13, window_bounds = array<i64: 2, 8, 4>}]} {
    %c0_i32 = arith.constant 0 : i32
    %0 = arith.cmpi eq, %arg0, %c0_i32 : i32
    %1 = arith.extui %0 : i1 to i32
    %c0_i32_0 = arith.constant 0 : i32
    %2 = arith.cmpi ne, %1, %c0_i32_0 : i32
    scf.if %2 {
      %cst_126 = arith.constant 0.000000e+00 : f32
      %221 = vector.broadcast %cst_126 : f32 to vector<2x32xf32>
      %c0_127 = arith.constant 0 : index
      %c0_128 = arith.constant 0 : index
      %222 = vector.load %arg15[%c0_127, %c0_128] : memref<2x32xf32, #tpu.memory_space<vmem>>, vector<2x32xf32>
      tpu.vector_store %arg15[%c0_127, %c0_128], %221 {strides = array<i32>} : memref<2x32xf32, #tpu.memory_space<vmem>>, vector<2x32xf32>,
      %cst_129 = arith.constant 0.000000e+00 : f32
      %223 = vector.broadcast %cst_129 : f32 to vector<2x32xf32>
      %c0_130 = arith.constant 0 : index
      %c0_131 = arith.constant 0 : index
      %224 = vector.load %arg16[%c0_130, %c0_131] : memref<2x32xf32, #tpu.memory_space<vmem>>, vector<2x32xf32>
      tpu.vector_store %arg16[%c0_130, %c0_131], %223 {strides = array<i32>} : memref<2x32xf32, #tpu.memory_space<vmem>>, vector<2x32xf32>,
    } else {
    }
    %c0 = arith.constant 0 : index
    %c0_1 = arith.constant 0 : index
    %c0_2 = arith.constant 0 : index
    %3 = vector.load %arg1[%c0, %c0_1, %c0_2] : memref<2x8x4xf32, #tpu.memory_space<vmem>>, vector<2x8x4xf32>
    %4 = vector.shape_cast %3 : vector<2x8x4xf32> to vector<16x4xf32>
    %c0_3 = arith.constant 0 : index
    %c0_4 = arith.constant 0 : index
    %5 = vector.load %arg9[%c0_3, %c0_4] : memref<1x32xf32, #tpu.memory_space<vmem>>, vector<1x32xf32>
    %c0_5 = arith.constant 0 : index
    %c0_6 = arith.constant 0 : index
    %6 = vector.load %arg2[%c0_5, %c0_6] : memref<4x32xf32, #tpu.memory_space<vmem>>, vector<4x32xf32>
    %cst = arith.constant dense<0.000000e+00> : vector<16x32xf32>
    %7 = tpu.matmul %4, %6, %cst {dimension_numbers = #tpu.dot_dimension_numbers<[1], [0], [0], [1], [0, 0, 1, 1], [], []>} : vector<16x4xf32>, vector<4x32xf32>, vector<16x32xf32> -> vector<16x32xf32>
    %8 = vector.broadcast %5 : vector<1x32xf32> to vector<16x32xf32>
    %9 = arith.mulf %8, %7 : vector<16x32xf32>
    %c0_7 = arith.constant 0 : index
    %c0_8 = arith.constant 0 : index
    %10 = vector.load %arg3[%c0_7, %c0_8] : memref<4x32xf32, #tpu.memory_space<vmem>>, vector<4x32xf32>
    %cst_9 = arith.constant dense<0.000000e+00> : vector<16x32xf32>
    %11 = tpu.matmul %4, %10, %cst_9 {dimension_numbers = #tpu.dot_dimension_numbers<[1], [0], [0], [1], [0, 0, 1, 1], [], []>} : vector<16x4xf32>, vector<4x32xf32>, vector<16x32xf32> -> vector<16x32xf32>
    %12 = vector.broadcast %5 : vector<1x32xf32> to vector<16x32xf32>
    %13 = arith.mulf %12, %11 : vector<16x32xf32>
    %14 = vector.shape_cast %9 : vector<16x32xf32> to vector<2x8x32xf32>
    %c0_10 = arith.constant 0 : index
    %c0_11 = arith.constant 0 : index
    %c0_12 = arith.constant 0 : index
    %15 = vector.load %arg17[%c0_10, %c0_11, %c0_12] : memref<2x8x32xf32, #tpu.memory_space<vmem>>, vector<2x8x32xf32>
    tpu.vector_store %arg17[%c0_10, %c0_11, %c0_12], %14 {strides = array<i32>} : memref<2x8x32xf32, #tpu.memory_space<vmem>>, vector<2x8x32xf32>,
    %16 = vector.shape_cast %13 : vector<16x32xf32> to vector<2x8x32xf32>
    %c0_13 = arith.constant 0 : index
    %c0_14 = arith.constant 0 : index
    %c0_15 = arith.constant 0 : index
    %17 = vector.load %arg18[%c0_13, %c0_14, %c0_15] : memref<2x8x32xf32, #tpu.memory_space<vmem>>, vector<2x8x32xf32>
    tpu.vector_store %arg18[%c0_13, %c0_14, %c0_15], %16 {strides = array<i32>} : memref<2x8x32xf32, #tpu.memory_space<vmem>>, vector<2x8x32xf32>,
    %c0_16 = arith.constant 0 : index
    %c0_17 = arith.constant 0 : index
    %18 = vector.load %arg7[%c0_16, %c0_17] : memref<1x32xf32, #tpu.memory_space<vmem>>, vector<1x32xf32>
    %19 = vector.shape_cast %18 : vector<1x32xf32> to vector<1x32xf32>
    %20 = vector.broadcast %19 : vector<1x32xf32> to vector<2x32xf32>
    %c0_18 = arith.constant 0 : index
    %c0_19 = arith.constant 0 : index
    %21 = vector.load %arg8[%c0_18, %c0_19] : memref<1x32xf32, #tpu.memory_space<vmem>>, vector<1x32xf32>
    %22 = vector.shape_cast %21 : vector<1x32xf32> to vector<1x32xf32>
    %23 = vector.broadcast %22 : vector<1x32xf32> to vector<2x32xf32>
    %c0_20 = arith.constant 0 : index
    %c0_21 = arith.constant 0 : index
    %24 = vector.load %arg15[%c0_20, %c0_21] : memref<2x32xf32, #tpu.memory_space<vmem>>, vector<2x32xf32>
    %c0_22 = arith.constant 0 : index
    %c0_23 = arith.constant 0 : index
    %25 = vector.load %arg16[%c0_22, %c0_23] : memref<2x32xf32, #tpu.memory_space<vmem>>, vector<2x32xf32>
    %c0_i32_24 = arith.constant 0 : i32
    %c0_25 = arith.constant 0 : index
    %26 = arith.index_cast %c0_i32_24 : i32 to index
    %c0_26 = arith.constant 0 : index
    %27 = vector.load %arg17[%c0_25, %26, %c0_26] : memref<2x8x32xf32, #tpu.memory_space<vmem>>, vector<2x1x32xf32>
    %28 = vector.shape_cast %27 : vector<2x1x32xf32> to vector<2x32xf32>
    %c0_27 = arith.constant 0 : index
    %29 = arith.index_cast %c0_i32_24 : i32 to index
    %c0_28 = arith.constant 0 : index
    %30 = vector.load %arg18[%c0_27, %29, %c0_28] : memref<2x8x32xf32, #tpu.memory_space<vmem>>, vector<2x1x32xf32>
    %31 = vector.shape_cast %30 : vector<2x1x32xf32> to vector<2x32xf32>
    %32 = arith.mulf %20, %24 : vector<2x32xf32>
    %33 = arith.mulf %23, %25 : vector<2x32xf32>
    %34 = arith.subf %32, %33 : vector<2x32xf32>
    %35 = arith.addf %34, %28 : vector<2x32xf32>
    %36 = arith.mulf %20, %25 : vector<2x32xf32>
    %37 = arith.mulf %23, %24 : vector<2x32xf32>
    %38 = arith.addf %36, %37 : vector<2x32xf32>
    %39 = arith.addf %38, %31 : vector<2x32xf32>
    %40 = vector.shape_cast %35 : vector<2x32xf32> to vector<2x1x32xf32>
    %c0_29 = arith.constant 0 : index
    %41 = arith.index_cast %c0_i32_24 : i32 to index
    %c0_30 = arith.constant 0 : index
    %42 = vector.load %arg17[%c0_29, %41, %c0_30] : memref<2x8x32xf32, #tpu.memory_space<vmem>>, vector<2x1x32xf32>
    tpu.vector_store %arg17[%c0_29, %41, %c0_30], %40 {strides = array<i32>} : memref<2x8x32xf32, #tpu.memory_space<vmem>>, vector<2x1x32xf32>,
    %43 = vector.shape_cast %39 : vector<2x32xf32> to vector<2x1x32xf32>
    %c0_31 = arith.constant 0 : index
    %44 = arith.index_cast %c0_i32_24 : i32 to index
    %c0_32 = arith.constant 0 : index
    %45 = vector.load %arg18[%c0_31, %44, %c0_32] : memref<2x8x32xf32, #tpu.memory_space<vmem>>, vector<2x1x32xf32>
    tpu.vector_store %arg18[%c0_31, %44, %c0_32], %43 {strides = array<i32>} : memref<2x8x32xf32, #tpu.memory_space<vmem>>, vector<2x1x32xf32>,
    %c1_i32 = arith.constant 1 : i32
    %c0_33 = arith.constant 0 : index
    %46 = arith.index_cast %c1_i32 : i32 to index
    %c0_34 = arith.constant 0 : index
    %47 = vector.load %arg17[%c0_33, %46, %c0_34] : memref<2x8x32xf32, #tpu.memory_space<vmem>>, vector<2x1x32xf32>
    %48 = vector.shape_cast %47 : vector<2x1x32xf32> to vector<2x32xf32>
    %c0_35 = arith.constant 0 : index
    %49 = arith.index_cast %c1_i32 : i32 to index
    %c0_36 = arith.constant 0 : index
    %50 = vector.load %arg18[%c0_35, %49, %c0_36] : memref<2x8x32xf32, #tpu.memory_space<vmem>>, vector<2x1x32xf32>
    %51 = vector.shape_cast %50 : vector<2x1x32xf32> to vector<2x32xf32>
    %52 = arith.mulf %20, %35 : vector<2x32xf32>
    %53 = arith.mulf %23, %39 : vector<2x32xf32>
    %54 = arith.subf %52, %53 : vector<2x32xf32>
    %55 = arith.addf %54, %48 : vector<2x32xf32>
    %56 = arith.mulf %20, %39 : vector<2x32xf32>
    %57 = arith.mulf %23, %35 : vector<2x32xf32>
    %58 = arith.addf %56, %57 : vector<2x32xf32>
    %59 = arith.addf %58, %51 : vector<2x32xf32>
    %60 = vector.shape_cast %55 : vector<2x32xf32> to vector<2x1x32xf32>
    %c0_37 = arith.constant 0 : index
    %61 = arith.index_cast %c1_i32 : i32 to index
    %c0_38 = arith.constant 0 : index
    %62 = vector.load %arg17[%c0_37, %61, %c0_38] : memref<2x8x32xf32, #tpu.memory_space<vmem>>, vector<2x1x32xf32>
    tpu.vector_store %arg17[%c0_37, %61, %c0_38], %60 {strides = array<i32>} : memref<2x8x32xf32, #tpu.memory_space<vmem>>, vector<2x1x32xf32>,
    %63 = vector.shape_cast %59 : vector<2x32xf32> to vector<2x1x32xf32>
    %c0_39 = arith.constant 0 : index
    %64 = arith.index_cast %c1_i32 : i32 to index
    %c0_40 = arith.constant 0 : index
    %65 = vector.load %arg18[%c0_39, %64, %c0_40] : memref<2x8x32xf32, #tpu.memory_space<vmem>>, vector<2x1x32xf32>
    tpu.vector_store %arg18[%c0_39, %64, %c0_40], %63 {strides = array<i32>} : memref<2x8x32xf32, #tpu.memory_space<vmem>>, vector<2x1x32xf32>,
    %c2_i32 = arith.constant 2 : i32
    %c0_41 = arith.constant 0 : index
    %66 = arith.index_cast %c2_i32 : i32 to index
    %c0_42 = arith.constant 0 : index
    %67 = vector.load %arg17[%c0_41, %66, %c0_42] : memref<2x8x32xf32, #tpu.memory_space<vmem>>, vector<2x1x32xf32>
    %68 = vector.shape_cast %67 : vector<2x1x32xf32> to vector<2x32xf32>
    %c0_43 = arith.constant 0 : index
    %69 = arith.index_cast %c2_i32 : i32 to index
    %c0_44 = arith.constant 0 : index
    %70 = vector.load %arg18[%c0_43, %69, %c0_44] : memref<2x8x32xf32, #tpu.memory_space<vmem>>, vector<2x1x32xf32>
    %71 = vector.shape_cast %70 : vector<2x1x32xf32> to vector<2x32xf32>
    %72 = arith.mulf %20, %55 : vector<2x32xf32>
    %73 = arith.mulf %23, %59 : vector<2x32xf32>
    %74 = arith.subf %72, %73 : vector<2x32xf32>
    %75 = arith.addf %74, %68 : vector<2x32xf32>
    %76 = arith.mulf %20, %59 : vector<2x32xf32>
    %77 = arith.mulf %23, %55 : vector<2x32xf32>
    %78 = arith.addf %76, %77 : vector<2x32xf32>
    %79 = arith.addf %78, %71 : vector<2x32xf32>
    %80 = vector.shape_cast %75 : vector<2x32xf32> to vector<2x1x32xf32>
    %c0_45 = arith.constant 0 : index
    %81 = arith.index_cast %c2_i32 : i32 to index
    %c0_46 = arith.constant 0 : index
    %82 = vector.load %arg17[%c0_45, %81, %c0_46] : memref<2x8x32xf32, #tpu.memory_space<vmem>>, vector<2x1x32xf32>
    tpu.vector_store %arg17[%c0_45, %81, %c0_46], %80 {strides = array<i32>} : memref<2x8x32xf32, #tpu.memory_space<vmem>>, vector<2x1x32xf32>,
    %83 = vector.shape_cast %79 : vector<2x32xf32> to vector<2x1x32xf32>
    %c0_47 = arith.constant 0 : index
    %84 = arith.index_cast %c2_i32 : i32 to index
    %c0_48 = arith.constant 0 : index
    %85 = vector.load %arg18[%c0_47, %84, %c0_48] : memref<2x8x32xf32, #tpu.memory_space<vmem>>, vector<2x1x32xf32>
    tpu.vector_store %arg18[%c0_47, %84, %c0_48], %83 {strides = array<i32>} : memref<2x8x32xf32, #tpu.memory_space<vmem>>, vector<2x1x32xf32>,
    %c3_i32 = arith.constant 3 : i32
    %c0_49 = arith.constant 0 : index
    %86 = arith.index_cast %c3_i32 : i32 to index
    %c0_50 = arith.constant 0 : index
    %87 = vector.load %arg17[%c0_49, %86, %c0_50] : memref<2x8x32xf32, #tpu.memory_space<vmem>>, vector<2x1x32xf32>
    %88 = vector.shape_cast %87 : vector<2x1x32xf32> to vector<2x32xf32>
    %c0_51 = arith.constant 0 : index
    %89 = arith.index_cast %c3_i32 : i32 to index
    %c0_52 = arith.constant 0 : index
    %90 = vector.load %arg18[%c0_51, %89, %c0_52] : memref<2x8x32xf32, #tpu.memory_space<vmem>>, vector<2x1x32xf32>
    %91 = vector.shape_cast %90 : vector<2x1x32xf32> to vector<2x32xf32>
    %92 = arith.mulf %20, %75 : vector<2x32xf32>
    %93 = arith.mulf %23, %79 : vector<2x32xf32>
    %94 = arith.subf %92, %93 : vector<2x32xf32>
    %95 = arith.addf %94, %88 : vector<2x32xf32>
    %96 = arith.mulf %20, %79 : vector<2x32xf32>
    %97 = arith.mulf %23, %75 : vector<2x32xf32>
    %98 = arith.addf %96, %97 : vector<2x32xf32>
    %99 = arith.addf %98, %91 : vector<2x32xf32>
    %100 = vector.shape_cast %95 : vector<2x32xf32> to vector<2x1x32xf32>
    %c0_53 = arith.constant 0 : index
    %101 = arith.index_cast %c3_i32 : i32 to index
    %c0_54 = arith.constant 0 : index
    %102 = vector.load %arg17[%c0_53, %101, %c0_54] : memref<2x8x32xf32, #tpu.memory_space<vmem>>, vector<2x1x32xf32>
    tpu.vector_store %arg17[%c0_53, %101, %c0_54], %100 {strides = array<i32>} : memref<2x8x32xf32, #tpu.memory_space<vmem>>, vector<2x1x32xf32>,
    %103 = vector.shape_cast %99 : vector<2x32xf32> to vector<2x1x32xf32>
    %c0_55 = arith.constant 0 : index
    %104 = arith.index_cast %c3_i32 : i32 to index
    %c0_56 = arith.constant 0 : index
    %105 = vector.load %arg18[%c0_55, %104, %c0_56] : memref<2x8x32xf32, #tpu.memory_space<vmem>>, vector<2x1x32xf32>
    tpu.vector_store %arg18[%c0_55, %104, %c0_56], %103 {strides = array<i32>} : memref<2x8x32xf32, #tpu.memory_space<vmem>>, vector<2x1x32xf32>,
    %c4_i32 = arith.constant 4 : i32
    %c0_57 = arith.constant 0 : index
    %106 = arith.index_cast %c4_i32 : i32 to index
    %c0_58 = arith.constant 0 : index
    %107 = vector.load %arg17[%c0_57, %106, %c0_58] : memref<2x8x32xf32, #tpu.memory_space<vmem>>, vector<2x1x32xf32>
    %108 = vector.shape_cast %107 : vector<2x1x32xf32> to vector<2x32xf32>
    %c0_59 = arith.constant 0 : index
    %109 = arith.index_cast %c4_i32 : i32 to index
    %c0_60 = arith.constant 0 : index
    %110 = vector.load %arg18[%c0_59, %109, %c0_60] : memref<2x8x32xf32, #tpu.memory_space<vmem>>, vector<2x1x32xf32>
    %111 = vector.shape_cast %110 : vector<2x1x32xf32> to vector<2x32xf32>
    %112 = arith.mulf %20, %95 : vector<2x32xf32>
    %113 = arith.mulf %23, %99 : vector<2x32xf32>
    %114 = arith.subf %112, %113 : vector<2x32xf32>
    %115 = arith.addf %114, %108 : vector<2x32xf32>
    %116 = arith.mulf %20, %99 : vector<2x32xf32>
    %117 = arith.mulf %23, %95 : vector<2x32xf32>
    %118 = arith.addf %116, %117 : vector<2x32xf32>
    %119 = arith.addf %118, %111 : vector<2x32xf32>
    %120 = vector.shape_cast %115 : vector<2x32xf32> to vector<2x1x32xf32>
    %c0_61 = arith.constant 0 : index
    %121 = arith.index_cast %c4_i32 : i32 to index
    %c0_62 = arith.constant 0 : index
    %122 = vector.load %arg17[%c0_61, %121, %c0_62] : memref<2x8x32xf32, #tpu.memory_space<vmem>>, vector<2x1x32xf32>
    tpu.vector_store %arg17[%c0_61, %121, %c0_62], %120 {strides = array<i32>} : memref<2x8x32xf32, #tpu.memory_space<vmem>>, vector<2x1x32xf32>,
    %123 = vector.shape_cast %119 : vector<2x32xf32> to vector<2x1x32xf32>
    %c0_63 = arith.constant 0 : index
    %124 = arith.index_cast %c4_i32 : i32 to index
    %c0_64 = arith.constant 0 : index
    %125 = vector.load %arg18[%c0_63, %124, %c0_64] : memref<2x8x32xf32, #tpu.memory_space<vmem>>, vector<2x1x32xf32>
    tpu.vector_store %arg18[%c0_63, %124, %c0_64], %123 {strides = array<i32>} : memref<2x8x32xf32, #tpu.memory_space<vmem>>, vector<2x1x32xf32>,
    %c5_i32 = arith.constant 5 : i32
    %c0_65 = arith.constant 0 : index
    %126 = arith.index_cast %c5_i32 : i32 to index
    %c0_66 = arith.constant 0 : index
    %127 = vector.load %arg17[%c0_65, %126, %c0_66] : memref<2x8x32xf32, #tpu.memory_space<vmem>>, vector<2x1x32xf32>
    %128 = vector.shape_cast %127 : vector<2x1x32xf32> to vector<2x32xf32>
    %c0_67 = arith.constant 0 : index
    %129 = arith.index_cast %c5_i32 : i32 to index
    %c0_68 = arith.constant 0 : index
    %130 = vector.load %arg18[%c0_67, %129, %c0_68] : memref<2x8x32xf32, #tpu.memory_space<vmem>>, vector<2x1x32xf32>
    %131 = vector.shape_cast %130 : vector<2x1x32xf32> to vector<2x32xf32>
    %132 = arith.mulf %20, %115 : vector<2x32xf32>
    %133 = arith.mulf %23, %119 : vector<2x32xf32>
    %134 = arith.subf %132, %133 : vector<2x32xf32>
    %135 = arith.addf %134, %128 : vector<2x32xf32>
    %136 = arith.mulf %20, %119 : vector<2x32xf32>
    %137 = arith.mulf %23, %115 : vector<2x32xf32>
    %138 = arith.addf %136, %137 : vector<2x32xf32>
    %139 = arith.addf %138, %131 : vector<2x32xf32>
    %140 = vector.shape_cast %135 : vector<2x32xf32> to vector<2x1x32xf32>
    %c0_69 = arith.constant 0 : index
    %141 = arith.index_cast %c5_i32 : i32 to index
    %c0_70 = arith.constant 0 : index
    %142 = vector.load %arg17[%c0_69, %141, %c0_70] : memref<2x8x32xf32, #tpu.memory_space<vmem>>, vector<2x1x32xf32>
    tpu.vector_store %arg17[%c0_69, %141, %c0_70], %140 {strides = array<i32>} : memref<2x8x32xf32, #tpu.memory_space<vmem>>, vector<2x1x32xf32>,
    %143 = vector.shape_cast %139 : vector<2x32xf32> to vector<2x1x32xf32>
    %c0_71 = arith.constant 0 : index
    %144 = arith.index_cast %c5_i32 : i32 to index
    %c0_72 = arith.constant 0 : index
    %145 = vector.load %arg18[%c0_71, %144, %c0_72] : memref<2x8x32xf32, #tpu.memory_space<vmem>>, vector<2x1x32xf32>
    tpu.vector_store %arg18[%c0_71, %144, %c0_72], %143 {strides = array<i32>} : memref<2x8x32xf32, #tpu.memory_space<vmem>>, vector<2x1x32xf32>,
    %c6_i32 = arith.constant 6 : i32
    %c0_73 = arith.constant 0 : index
    %146 = arith.index_cast %c6_i32 : i32 to index
    %c0_74 = arith.constant 0 : index
    %147 = vector.load %arg17[%c0_73, %146, %c0_74] : memref<2x8x32xf32, #tpu.memory_space<vmem>>, vector<2x1x32xf32>
    %148 = vector.shape_cast %147 : vector<2x1x32xf32> to vector<2x32xf32>
    %c0_75 = arith.constant 0 : index
    %149 = arith.index_cast %c6_i32 : i32 to index
    %c0_76 = arith.constant 0 : index
    %150 = vector.load %arg18[%c0_75, %149, %c0_76] : memref<2x8x32xf32, #tpu.memory_space<vmem>>, vector<2x1x32xf32>
    %151 = vector.shape_cast %150 : vector<2x1x32xf32> to vector<2x32xf32>
    %152 = arith.mulf %20, %135 : vector<2x32xf32>
    %153 = arith.mulf %23, %139 : vector<2x32xf32>
    %154 = arith.subf %152, %153 : vector<2x32xf32>
    %155 = arith.addf %154, %148 : vector<2x32xf32>
    %156 = arith.mulf %20, %139 : vector<2x32xf32>
    %157 = arith.mulf %23, %135 : vector<2x32xf32>
    %158 = arith.addf %156, %157 : vector<2x32xf32>
    %159 = arith.addf %158, %151 : vector<2x32xf32>
    %160 = vector.shape_cast %155 : vector<2x32xf32> to vector<2x1x32xf32>
    %c0_77 = arith.constant 0 : index
    %161 = arith.index_cast %c6_i32 : i32 to index
    %c0_78 = arith.constant 0 : index
    %162 = vector.load %arg17[%c0_77, %161, %c0_78] : memref<2x8x32xf32, #tpu.memory_space<vmem>>, vector<2x1x32xf32>
    tpu.vector_store %arg17[%c0_77, %161, %c0_78], %160 {strides = array<i32>} : memref<2x8x32xf32, #tpu.memory_space<vmem>>, vector<2x1x32xf32>,
    %163 = vector.shape_cast %159 : vector<2x32xf32> to vector<2x1x32xf32>
    %c0_79 = arith.constant 0 : index
    %164 = arith.index_cast %c6_i32 : i32 to index
    %c0_80 = arith.constant 0 : index
    %165 = vector.load %arg18[%c0_79, %164, %c0_80] : memref<2x8x32xf32, #tpu.memory_space<vmem>>, vector<2x1x32xf32>
    tpu.vector_store %arg18[%c0_79, %164, %c0_80], %163 {strides = array<i32>} : memref<2x8x32xf32, #tpu.memory_space<vmem>>, vector<2x1x32xf32>,
    %c7_i32 = arith.constant 7 : i32
    %c0_81 = arith.constant 0 : index
    %166 = arith.index_cast %c7_i32 : i32 to index
    %c0_82 = arith.constant 0 : index
    %167 = vector.load %arg17[%c0_81, %166, %c0_82] : memref<2x8x32xf32, #tpu.memory_space<vmem>>, vector<2x1x32xf32>
    %168 = vector.shape_cast %167 : vector<2x1x32xf32> to vector<2x32xf32>
    %c0_83 = arith.constant 0 : index
    %169 = arith.index_cast %c7_i32 : i32 to index
    %c0_84 = arith.constant 0 : index
    %170 = vector.load %arg18[%c0_83, %169, %c0_84] : memref<2x8x32xf32, #tpu.memory_space<vmem>>, vector<2x1x32xf32>
    %171 = vector.shape_cast %170 : vector<2x1x32xf32> to vector<2x32xf32>
    %172 = arith.mulf %20, %155 : vector<2x32xf32>
    %173 = arith.mulf %23, %159 : vector<2x32xf32>
    %174 = arith.subf %172, %173 : vector<2x32xf32>
    %175 = arith.addf %174, %168 : vector<2x32xf32>
    %176 = arith.mulf %20, %159 : vector<2x32xf32>
    %177 = arith.mulf %23, %155 : vector<2x32xf32>
    %178 = arith.addf %176, %177 : vector<2x32xf32>
    %179 = arith.addf %178, %171 : vector<2x32xf32>
    %180 = vector.shape_cast %175 : vector<2x32xf32> to vector<2x1x32xf32>
    %c0_85 = arith.constant 0 : index
    %181 = arith.index_cast %c7_i32 : i32 to index
    %c0_86 = arith.constant 0 : index
    %182 = vector.load %arg17[%c0_85, %181, %c0_86] : memref<2x8x32xf32, #tpu.memory_space<vmem>>, vector<2x1x32xf32>
    tpu.vector_store %arg17[%c0_85, %181, %c0_86], %180 {strides = array<i32>} : memref<2x8x32xf32, #tpu.memory_space<vmem>>, vector<2x1x32xf32>,
    %183 = vector.shape_cast %179 : vector<2x32xf32> to vector<2x1x32xf32>
    %c0_87 = arith.constant 0 : index
    %184 = arith.index_cast %c7_i32 : i32 to index
    %c0_88 = arith.constant 0 : index
    %185 = vector.load %arg18[%c0_87, %184, %c0_88] : memref<2x8x32xf32, #tpu.memory_space<vmem>>, vector<2x1x32xf32>
    tpu.vector_store %arg18[%c0_87, %184, %c0_88], %183 {strides = array<i32>} : memref<2x8x32xf32, #tpu.memory_space<vmem>>, vector<2x1x32xf32>,
    %c8_i32 = arith.constant 8 : i32
    %c0_89 = arith.constant 0 : index
    %c0_90 = arith.constant 0 : index
    %186 = vector.load %arg15[%c0_89, %c0_90] : memref<2x32xf32, #tpu.memory_space<vmem>>, vector<2x32xf32>
    tpu.vector_store %arg15[%c0_89, %c0_90], %175 {strides = array<i32>} : memref<2x32xf32, #tpu.memory_space<vmem>>, vector<2x32xf32>,
    %c0_91 = arith.constant 0 : index
    %c0_92 = arith.constant 0 : index
    %187 = vector.load %arg16[%c0_91, %c0_92] : memref<2x32xf32, #tpu.memory_space<vmem>>, vector<2x32xf32>
    tpu.vector_store %arg16[%c0_91, %c0_92], %179 {strides = array<i32>} : memref<2x32xf32, #tpu.memory_space<vmem>>, vector<2x32xf32>,
    %c0_93 = arith.constant 0 : index
    %c0_94 = arith.constant 0 : index
    %c0_95 = arith.constant 0 : index
    %188 = vector.load %arg17[%c0_93, %c0_94, %c0_95] : memref<2x8x32xf32, #tpu.memory_space<vmem>>, vector<2x8x32xf32>
    %189 = vector.shape_cast %188 : vector<2x8x32xf32> to vector<16x32xf32>
    %c0_96 = arith.constant 0 : index
    %c0_97 = arith.constant 0 : index
    %c0_98 = arith.constant 0 : index
    %190 = vector.load %arg18[%c0_96, %c0_97, %c0_98] : memref<2x8x32xf32, #tpu.memory_space<vmem>>, vector<2x8x32xf32>
    %191 = vector.shape_cast %190 : vector<2x8x32xf32> to vector<16x32xf32>
    %c0_99 = arith.constant 0 : index
    %c0_100 = arith.constant 0 : index
    %192 = vector.load %arg4[%c0_99, %c0_100] : memref<32x4xf32, #tpu.memory_space<vmem>>, vector<32x4xf32>
    %cst_101 = arith.constant dense<0.000000e+00> : vector<16x4xf32>
    %193 = tpu.matmul %189, %192, %cst_101 {dimension_numbers = #tpu.dot_dimension_numbers<[1], [0], [0], [1], [0, 0, 1, 1], [], []>} : vector<16x32xf32>, vector<32x4xf32>, vector<16x4xf32> -> vector<16x4xf32>
    %c0_102 = arith.constant 0 : index
    %c0_103 = arith.constant 0 : index
    %194 = vector.load %arg5[%c0_102, %c0_103] : memref<32x4xf32, #tpu.memory_space<vmem>>, vector<32x4xf32>
    %cst_104 = arith.constant dense<0.000000e+00> : vector<16x4xf32>
    %195 = tpu.matmul %191, %194, %cst_104 {dimension_numbers = #tpu.dot_dimension_numbers<[1], [0], [0], [1], [0, 0, 1, 1], [], []>} : vector<16x32xf32>, vector<32x4xf32>, vector<16x4xf32> -> vector<16x4xf32>
    %196 = arith.subf %193, %195 : vector<16x4xf32>
    %c0_105 = arith.constant 0 : index
    %c0_106 = arith.constant 0 : index
    %197 = vector.load %arg6[%c0_105, %c0_106] : memref<4x4xf32, #tpu.memory_space<vmem>>, vector<4x4xf32>
    %cst_107 = arith.constant dense<0.000000e+00> : vector<16x4xf32>
    %198 = tpu.matmul %4, %197, %cst_107 {dimension_numbers = #tpu.dot_dimension_numbers<[1], [0], [0], [1], [0, 0, 1, 1], [], []>} : vector<16x4xf32>, vector<4x4xf32>, vector<16x4xf32> -> vector<16x4xf32>
    %cst_108 = arith.constant 2.000000e+00 : f32
    %199 = vector.broadcast %cst_108 : f32 to vector<16x4xf32>
    %200 = arith.mulf %199, %196 : vector<16x4xf32>
    %201 = arith.addf %200, %198 : vector<16x4xf32>
    %c0_109 = arith.constant 0 : index
    %c0_110 = arith.constant 0 : index
    %202 = vector.load %arg10[%c0_109, %c0_110] : memref<4x30xf32, #tpu.memory_space<vmem>>, vector<4x30xf32>
    %cst_111 = arith.constant dense<0.000000e+00> : vector<16x30xf32>
    %203 = tpu.matmul %201, %202, %cst_111 {dimension_numbers = #tpu.dot_dimension_numbers<[1], [0], [0], [1], [0, 0, 1, 1], [], []>} : vector<16x4xf32>, vector<4x30xf32>, vector<16x30xf32> -> vector<16x30xf32>
    %204 = arith.negf %203 : vector<16x30xf32>
    %205 = math.exp %204 : vector<16x30xf32>
    %cst_112 = arith.constant 1.000000e+00 : f32
    %206 = vector.broadcast %cst_112 : f32 to vector<16x30xf32>
    %207 = arith.addf %206, %205 : vector<16x30xf32>
    %208 = arith.divf %206, %207 : vector<16x30xf32>
    %209 = arith.mulf %203, %208 : vector<16x30xf32>
    %c0_113 = arith.constant 0 : index
    %c0_114 = arith.constant 0 : index
    %210 = vector.load %arg11[%c0_113, %c0_114] : memref<30x30xf32, #tpu.memory_space<vmem>>, vector<30x30xf32>
    %cst_115 = arith.constant dense<0.000000e+00> : vector<16x30xf32>
    %211 = tpu.matmul %209, %210, %cst_115 {dimension_numbers = #tpu.dot_dimension_numbers<[1], [0], [0], [1], [0, 0, 1, 1], [], []>} : vector<16x30xf32>, vector<30x30xf32>, vector<16x30xf32> -> vector<16x30xf32>
    %cst_116 = arith.constant 0.000000e+00 : f32
    %212 = vector.broadcast %cst_116 : f32 to vector<16x30xf32>
    %213 = arith.maximumf %211, %212 : vector<16x30xf32>
    %c0_117 = arith.constant 0 : index
    %c0_118 = arith.constant 0 : index
    %214 = vector.load %arg12[%c0_117, %c0_118] : memref<30x4xf32, #tpu.memory_space<vmem>>, vector<30x4xf32>
    %cst_119 = arith.constant dense<0.000000e+00> : vector<16x4xf32>
    %215 = tpu.matmul %213, %214, %cst_119 {dimension_numbers = #tpu.dot_dimension_numbers<[1], [0], [0], [1], [0, 0, 1, 1], [], []>} : vector<16x30xf32>, vector<30x4xf32>, vector<16x4xf32> -> vector<16x4xf32>
    %c0_120 = arith.constant 0 : index
    %c0_121 = arith.constant 0 : index
    %216 = vector.load %arg13[%c0_120, %c0_121] : memref<4x4xf32, #tpu.memory_space<vmem>>, vector<4x4xf32>
    %cst_122 = arith.constant dense<0.000000e+00> : vector<16x4xf32>
    %217 = tpu.matmul %4, %216, %cst_122 {dimension_numbers = #tpu.dot_dimension_numbers<[1], [0], [0], [1], [0, 0, 1, 1], [], []>} : vector<16x4xf32>, vector<4x4xf32>, vector<16x4xf32> -> vector<16x4xf32>
    %218 = arith.addf %215, %217 : vector<16x4xf32>
    %219 = vector.shape_cast %218 : vector<16x4xf32> to vector<2x8x4xf32>
    %c0_123 = arith.constant 0 : index
    %c0_124 = arith.constant 0 : index
    %c0_125 = arith.constant 0 : index
    %220 = vector.load %arg14[%c0_123, %c0_124, %c0_125] : memref<2x8x4xf32, #tpu.memory_space<vmem>>, vector<2x8x4xf32>
    tpu.vector_store %arg14[%c0_123, %c0_124, %c0_125], %219 {strides = array<i32>} : memref<2x8x4xf32, #tpu.memory_space<vmem>>, vector<2x8x4xf32>,
    return
  }
  func.func @transform_0(%arg0: i32) -> (i32, i32, i32) {
    %c0_i32 = arith.constant 0 : i32
    %c0_i32_0 = arith.constant 0 : i32
    %c0_i32_1 = arith.constant 0 : i32
    return %c0_i32, %arg0, %c0_i32_0 : i32, i32, i32
  }
  func.func @transform_1(%arg0: i32) -> (i32, i32) {
    %c0_i32 = arith.constant 0 : i32
    %c0_i32_0 = arith.constant 0 : i32
    %c0_i32_1 = arith.constant 0 : i32
    return %c0_i32, %c0_i32_0 : i32, i32
  }
  func.func @transform_2(%arg0: i32) -> (i32, i32) {
    %c0_i32 = arith.constant 0 : i32
    %c0_i32_0 = arith.constant 0 : i32
    %c0_i32_1 = arith.constant 0 : i32
    return %c0_i32, %c0_i32_0 : i32, i32
  }
  func.func @transform_3(%arg0: i32) -> (i32, i32) {
    %c0_i32 = arith.constant 0 : i32
    %c0_i32_0 = arith.constant 0 : i32
    %c0_i32_1 = arith.constant 0 : i32
    return %c0_i32, %c0_i32_0 : i32, i32
  }
  func.func @transform_4(%arg0: i32) -> (i32, i32) {
    %c0_i32 = arith.constant 0 : i32
    %c0_i32_0 = arith.constant 0 : i32
    %c0_i32_1 = arith.constant 0 : i32
    return %c0_i32, %c0_i32_0 : i32, i32
  }
  func.func @transform_5(%arg0: i32) -> (i32, i32) {
    %c0_i32 = arith.constant 0 : i32
    %c0_i32_0 = arith.constant 0 : i32
    %c0_i32_1 = arith.constant 0 : i32
    return %c0_i32, %c0_i32_0 : i32, i32
  }
  func.func @transform_6(%arg0: i32) -> (i32, i32) {
    %c0_i32 = arith.constant 0 : i32
    %c0_i32_0 = arith.constant 0 : i32
    %c0_i32_1 = arith.constant 0 : i32
    return %c0_i32, %c0_i32_0 : i32, i32
  }
  func.func @transform_7(%arg0: i32) -> (i32, i32) {
    %c0_i32 = arith.constant 0 : i32
    %c0_i32_0 = arith.constant 0 : i32
    %c0_i32_1 = arith.constant 0 : i32
    return %c0_i32, %c0_i32_0 : i32, i32
  }
  func.func @transform_8(%arg0: i32) -> (i32, i32) {
    %c0_i32 = arith.constant 0 : i32
    %c0_i32_0 = arith.constant 0 : i32
    %c0_i32_1 = arith.constant 0 : i32
    return %c0_i32, %c0_i32_0 : i32, i32
  }
  func.func @transform_9(%arg0: i32) -> (i32, i32) {
    %c0_i32 = arith.constant 0 : i32
    %c0_i32_0 = arith.constant 0 : i32
    %c0_i32_1 = arith.constant 0 : i32
    return %c0_i32, %c0_i32_0 : i32, i32
  }
  func.func @transform_10(%arg0: i32) -> (i32, i32) {
    %c0_i32 = arith.constant 0 : i32
    %c0_i32_0 = arith.constant 0 : i32
    %c0_i32_1 = arith.constant 0 : i32
    return %c0_i32, %c0_i32_0 : i32, i32
  }
  func.func @transform_11(%arg0: i32) -> (i32, i32) {
    %c0_i32 = arith.constant 0 : i32
    %c0_i32_0 = arith.constant 0 : i32
    %c0_i32_1 = arith.constant 0 : i32
    return %c0_i32, %c0_i32_0 : i32, i32
  }
  func.func @transform_12(%arg0: i32) -> (i32, i32) {
    %c0_i32 = arith.constant 0 : i32
    %c0_i32_0 = arith.constant 0 : i32
    %c0_i32_1 = arith.constant 0 : i32
    return %c0_i32, %c0_i32_0 : i32, i32
  }
  func.func @transform_13(%arg0: i32) -> (i32, i32, i32) {
    %c0_i32 = arith.constant 0 : i32
    %c0_i32_0 = arith.constant 0 : i32
    %c0_i32_1 = arith.constant 0 : i32
    return %c0_i32, %arg0, %c0_i32_0 : i32, i32, i32
  }
}

</mosaic_0001>

<bundles_post_ra>
// kernel: ssm_forward.1
= control target key start
LH: loop header
LB: loop body
LE: loop exit
PB: predicated region body
PF: predicated region fallthrough
CT: control target
= control target key end

     0   :  { %vm62_vm0 = vcmask 1043456   ;;  %vm55_vm1 = vcmask 31744   ;;  %vm48_vm2 = vcmask 254976   ;;  %v724_v4 = vmov 0.0   ;;  %s1011_s1 = inlined_call_operand.vmem [shape: f32[4,32], index: 1, kind: input, shape index: {}]   ;;  %s1012_s0 = inlined_call_operand.vmem [shape: f32[2,8,4], index: 0, kind: input, shape index: {}]   ;;  %s1013_s2 = inlined_call_operand.vmem [shape: f32[4,32], index: 2, kind: input, shape index: {}]   ;;  %s1014_s8 = inlined_call_operand.vmem [shape: f32[1,32], index: 8, kind: input, shape index: {}]   ;;  %s1015_s6 = inlined_call_operand.vmem [shape: f32[1,32], index: 6, kind: input, shape index: {}]   ;;  %s1016_s7 = inlined_call_operand.vmem [shape: f32[1,32], index: 7, kind: input, shape index: {}]   ;;  %s1017_s3 = inlined_call_operand.vmem [shape: f32[32,4], index: 3, kind: input, shape index: {}]   ;;  %s1018_s4 = inlined_call_operand.vmem [shape: f32[32,4], index: 4, kind: input, shape index: {}]   ;;  %s1019_s5 = inlined_call_operand.vmem [shape: f32[4,4], index: 5, kind: input, shape index: {}]   ;;  %s1020_s9 = inlined_call_operand.vmem [shape: f32[4,30], index: 9, kind: input, shape index: {}]   ;;  %s1021_s10 = inlined_call_operand.vmem [shape: f32[30,30], index: 10, kind: input, shape index: {}]   ;;  %s1022_s12 = inlined_call_operand.vmem [shape: f32[4,4], index: 12, kind: input, shape index: {}]   ;;  %s1023_s11 = inlined_call_operand.vmem [shape: f32[30,4], index: 11, kind: input, shape index: {}]   ;;  %s1024_s13 = inlined_call_operand.vmem [shape: f32[2,8,4], index: 13, kind: output, shape index: {}]  }
   0x1   :  { %v54_v0 = vld [vmem:[%s1011_s1] sm:$0xf]  ;;  %v801_v1 = vld [vmem:[%s1012_s0 + $0x8] sm:$0xff]  ;;  %49 = vst.msk [vmem:[#allocation2] sm:$0x3] %vm48_vm2, %v724_v4  ;;  %vm123_vm3 = vcmask 261120  }
   0x2   :  { %v94_v2 = vld [vmem:[%s1013_s2] sm:$0xf]  ;;  %711 = vmatpush.msk.msra.mxu1 %vm62_vm0, %v54_v0  ;;  %684 = vmatpush.msk.msra.mxu0 %vm62_vm0, %v54_v0  ;;  %50 = vst.msk [vmem:[#allocation3] sm:$0x3] %vm48_vm2, %v724_v4  ;;  %vm148_vm4 = vcmask 1041409   ;;  %vm164_vm5 = vcmask 253952  }
   0x3   :  { %v811_v3 = vld [vmem:[%s1012_s0] sm:$0xff]  ;;  %686 = vmatmul.msk.f32.vlgmr.msra.gmra.mxu1 %vm55_vm1, %v801_v1  ;;  %vm586_vm6 = vcmask 1045504   ;;  %vm579_vm11 = vcmask 244736  }
   0x4   :  { %685 = vmatmul.msk.f32.vlgmr.msra.gmra.mxu0 %vm55_vm1, %v811_v3  ;;  %687 = vmatpush.msk.msrb.mxu1 %vm62_vm0, %v94_v2  ;;  %v713_v5 = vld [vmem:[%s1014_s8] ss:$0 sm:$0xff] }
   0x5   :  { %v832_v10 = vld [vmem:[%s1015_s6] ss:$0 sm:$0xff] }
   0x6   :  { %v837_v11 = vld [vmem:[%s1016_s7] ss:$0 sm:$0xff] }
   0x8   :  { %v136_v12 = vld [vmem:[#allocation2] sm:$0x3] }
   0x9   :  { %v137_v13 = vld [vmem:[#allocation3] sm:$0x3]  ;;  %v142_v14 = vmul.f32 %v832_v10, %v136_v12  ;;  %v153_v28 = vmul.f32 %v837_v11, %v136_v12  ;;  %v406_v12 = vld [vmem:[%s1017_s3 + $0x18] sm:$0xff] }
   0xa   :  { %v143_v15 = vmul.f32 %v837_v11, %v137_v13  ;;  %v152_v27 = vmul.f32 %v832_v10, %v137_v13  ;;  %v439_v13 = vld [vmem:[%s1018_s4 + $0x18] sm:$0xff]  ;;  %425 = vmatpush.msra.mxu2 %v406_v12 }
   0xb   :  { %688 = vmatmul.msk.f32.vlgmr.msrb.gmra.mxu1 %vm55_vm1, %v811_v3  ;;  %458 = vmatpush.msra.mxu3 %v439_v13 }
   0xc   :  { %v144_v20 = vsub.f32 %v142_v14, %v143_v15  ;;  %v154_v30 = vadd.f32 %v153_v28, %v152_v27  ;;  %v405_v14 = vld [vmem:[%s1017_s3 + $0x10] sm:$0xff] }
   0xd   :  { %426 = vmatpush.msra.mxu2 %v405_v14 }
  0x13   :  { %689 = vmatmul.msk.f32.gmra.mxu1 %vm55_vm1, %v801_v1 }
  0x80   :  { %v86_v6 = vpop.f32.mrf.mxu1 }
  0x81   :  { %v83_v7 = vpop.f32.mrf.mxu0  ;;  %v93_v8 = vmul.f32 %v713_v5, %v86_v6 }
  0x82   :  { %v92_v9 = vmul.f32 %v713_v5, %v83_v7 }
  0x83   :  { %125 = vst.msk [vmem:[#allocation4 + $0x8] sm:$0xff] %vm123_vm3, %v93_v8 }
  0x84   :  { %124 = vst.msk [vmem:[#allocation4] sm:$0xff] %vm123_vm3, %v92_v9 }
  0x88   :  { %v115_v16 = vpop.f32.mrf.mxu1 }
  0x89   :  { %v121_v17 = vmul.f32 %v713_v5, %v115_v16 }
  0x8a   :  { %v139_v18 = vld [vmem:[#allocation4 + $0x8] sm:$0x1]  ;;  %v173_v32 = vld [vmem:[#allocation4 + $0x9] sm:$0x1]  ;;  %v205_v45 = vld [vmem:[#allocation4 + $0xa] sm:$0x1] }
  0x8b   :  { %v147_v19 = vrot.slane %v139_v18, 7  ;;  %126 = vst.msk [vmem:[#allocation5] sm:$0xff] %vm123_vm3, %v121_v17  ;;  %v138_v21 = vld [vmem:[#allocation4] sm:$0x1]  ;;  %v181_v37 = vrot.slane %v173_v32, 7  ;;  %v213_v54 = vrot.slane %v205_v45, 7 }
  0x8c   :  { %v172_v39 = vld [vmem:[#allocation4 + $0x1] sm:$0x1]  ;;  %v204_v56 = vld [vmem:[#allocation4 + $0x2] sm:$0x1]  ;;  %v237_v63 = vld [vmem:[#allocation4 + $0xb] sm:$0x1] }
  0x8d   :  { %v149_v22 = vsel %vm148_vm4, %v147_v19, %v138_v21  ;;  %v182_v50 = vsel %vm148_vm4, %v181_v37, %v172_v39  ;;  %v214_v6 = vsel %vm148_vm4, %v213_v54, %v204_v56  ;;  %v245_v15 = vrot.slane %v237_v63, 7  ;;  %v438_v17 = vld [vmem:[%s1018_s4 + $0x10] sm:$0xff]  ;;  %v236_v19 = vld [vmem:[#allocation4 + $0x3] sm:$0x1]  ;;  %v471_v54 = vld [vmem:[%s1019_s5] sm:$0xf] }
  0x8e   :  { %v151_v23 = vadd.f32 %v149_v22, %v144_v20  ;;  %v269_v18 = vld [vmem:[#allocation4 + $0xc] sm:$0x1]  ;;  %459 = vmatpush.msra.mxu3 %v438_v17  ;;  %v403_v32 = vld [vmem:[%s1017_s3] sm:$0xff]  ;;  %694 = vmatpush.msk.msrb.mxu0 %vm62_vm0, %v471_v54 }
  0x8f   :  { %695 = vmatmul.msk.f32.vlgmr.msrb.gmra.mxu0 %vm55_vm1, %v811_v3  ;;  %v502_v17 = vld [vmem:[%s1020_s9] sm:$0xf] }
  0x90   :  { %v118_v24 = vpop.f32.mrf.mxu1  ;;  %v162_v26 = vrot.slane %v151_v23, 1  ;;  %165 = vst.msk [vmem:[#allocation4] sm:$0x1] %vm164_vm5, %v151_v23  ;;  %v176_v40 = vmul.f32 %v832_v10, %v151_v23  ;;  %v186_v43 = vmul.f32 %v837_v11, %v151_v23  ;;  %697 = vmatpush.msk.msra.mxu1 %vm62_vm0, %v502_v17 }
  0x91   :  { %v122_v25 = vmul.f32 %v713_v5, %v118_v24  ;;  %v404_v24 = vld [vmem:[%s1017_s3 + $0x8] sm:$0xff] }
  0x92   :  { %166 = vst.msk [vmem:[#allocation4 + $0x8] sm:$0x1] %vm164_vm5, %v162_v26  ;;  %v140_v33 = vld [vmem:[#allocation5] sm:$0x1]  ;;  %v174_v46 = vld [vmem:[#allocation5 + $0x1] sm:$0x1]  ;;  %427 = vmatpush.msra.mxu2 %v404_v24 }
  0x93   :  { %127 = vst.msk [vmem:[#allocation5 + $0x8] sm:$0xff] %vm123_vm3, %v122_v25  ;;  %v206_v0 = vld [vmem:[#allocation5 + $0x2] sm:$0x1]  ;;  %v437_v25 = vld [vmem:[%s1018_s4 + $0x8] sm:$0xff]  ;;  %v238_v26 = vld [vmem:[#allocation5 + $0x3] sm:$0x1] }
  0x94   :  { %460 = vmatpush.msra.mxu3 %v437_v25  ;;  %428 = vmatpush.msra.mxu2 %v403_v32  ;;  %v365_v25 = vld [vmem:[#allocation4 + $0xf] sm:$0x1] }
  0x97   :  { %696 = vmatmul.msk.f32.gmra.mxu0 %vm55_vm1, %v801_v1 }
  0x9a   :  { %v141_v29 = vld [vmem:[#allocation5 + $0x8] sm:$0x1]  ;;  %v175_v34 = vld [vmem:[#allocation5 + $0x9] sm:$0x1]  ;;  %v207_v49 = vld [vmem:[#allocation5 + $0xa] sm:$0x1] }
  0x9b   :  { %v157_v31 = vrot.slane %v141_v29, 7  ;;  %v190_v38 = vrot.slane %v175_v34, 7  ;;  %v222_v55 = vrot.slane %v207_v49, 7  ;;  %v239_v5 = vld [vmem:[#allocation5 + $0xb] sm:$0x1]  ;;  %v246_v34 = vsel %vm148_vm4, %v245_v15, %v236_v19 }
  0x9c   :  { %v254_v16 = vrot.slane %v239_v5, 7  ;;  %v302_v5 = vld [vmem:[#allocation5 + $0x5] sm:$0x1] }
  0x9d   :  { %v158_v35 = vsel %vm148_vm4, %v157_v31, %v140_v33  ;;  %v191_v51 = vsel %vm148_vm4, %v190_v38, %v174_v46  ;;  %v223_v7 = vsel %vm148_vm4, %v222_v55, %v206_v0  ;;  %v271_v31 = vld [vmem:[#allocation5 + $0xc] sm:$0x1]  ;;  %v277_v38 = vrot.slane %v269_v18, 7  ;;  %v332_v18 = vld [vmem:[#allocation4 + $0x6] sm:$0x1] }
  0x9e   :  { %v160_v36 = vadd.f32 %v158_v35, %v154_v30  ;;  %v436_v33 = vld [vmem:[%s1018_s4] sm:$0xff]  ;;  %v255_v35 = vsel %vm148_vm4, %v254_v16, %v238_v26  ;;  %v286_v39 = vrot.slane %v271_v31, 7  ;;  %v334_v26 = vld [vmem:[#allocation5 + $0x6] sm:$0x1] }
  0x9f   :  { %461 = vmatpush.msra.mxu3 %v436_v33 }
  0xa0   :  { %v177_v41 = vmul.f32 %v837_v11, %v160_v36  ;;  %v185_v42 = vmul.f32 %v832_v10, %v160_v36  ;;  %170 = vst.msk [vmem:[#allocation5] sm:$0x1] %vm164_vm5, %v160_v36  ;;  %v168_v44 = vrot.slane %v160_v36, 1 }
  0xa2   :  { %v178_v47 = vsub.f32 %v176_v40, %v177_v41  ;;  %v187_v48 = vadd.f32 %v186_v43, %v185_v42  ;;  %171 = vst.msk [vmem:[#allocation5 + $0x8] sm:$0x1] %vm164_vm5, %v168_v44  ;;  %v268_v40 = vld [vmem:[#allocation4 + $0x4] sm:$0x1] }
  0xa4   :  { %v184_v52 = vadd.f32 %v182_v50, %v178_v47  ;;  %v193_v53 = vadd.f32 %v191_v51, %v187_v48  ;;  %v301_v47 = vld [vmem:[#allocation4 + $0xd] sm:$0x1]  ;;  %v270_v48 = vld [vmem:[#allocation5 + $0x4] sm:$0x1]  ;;  %v303_v51 = vld [vmem:[#allocation5 + $0xd] sm:$0x1] }
  0xa6   :  { %v208_v57 = vmul.f32 %v832_v10, %v184_v52  ;;  %v209_v58 = vmul.f32 %v837_v11, %v193_v53  ;;  %v217_v59 = vmul.f32 %v832_v10, %v193_v53  ;;  %v218_v60 = vmul.f32 %v837_v11, %v184_v52  ;;  %197 = vst.msk [vmem:[#allocation4 + $0x1] sm:$0x1] %vm164_vm5, %v184_v52 }
  0xa7   :  { %202 = vst.msk [vmem:[#allocation5 + $0x1] sm:$0x1] %vm164_vm5, %v193_v53  ;;  %v195_v61 = vrot.slane %v184_v52, 1  ;;  %v200_v62 = vrot.slane %v193_v53, 1  ;;  %v278_v52 = vsel %vm148_vm4, %v277_v38, %v268_v40  ;;  %v287_v53 = vsel %vm148_vm4, %v286_v39, %v270_v48 }
  0xa8   :  { %v210_v2 = vsub.f32 %v208_v57, %v209_v58  ;;  %v219_v4 = vadd.f32 %v218_v60, %v217_v59  ;;  %v309_v57 = vrot.slane %v301_v47, 7  ;;  %v318_v58 = vrot.slane %v303_v51, 7  ;;  %v300_v59 = vld [vmem:[#allocation4 + $0x5] sm:$0x1] }
  0xa9   :  { %198 = vst.msk [vmem:[#allocation4 + $0x9] sm:$0x1] %vm164_vm5, %v195_v61 }
  0xaa   :  { %v216_v8 = vadd.f32 %v214_v6, %v210_v2  ;;  %v225_v9 = vadd.f32 %v223_v7, %v219_v4  ;;  %203 = vst.msk [vmem:[#allocation5 + $0x9] sm:$0x1] %vm164_vm5, %v200_v62  ;;  %v333_v4 = vld [vmem:[#allocation4 + $0xe] sm:$0x1]  ;;  %v319_v12 = vsel %vm148_vm4, %v318_v58, %v302_v5 }
  0xab   :  { %v341_v15 = vrot.slane %v333_v4, 7  ;;  %v578_v4 = vld [vmem:[%s1021_s10 + $0x18] sm:$0x3f]  ;;  %v577_v5 = vld [vmem:[%s1021_s10 + $0x10] sm:$0xff] }
  0xac   :  { %v240_v20 = vmul.f32 %v832_v10, %v216_v8  ;;  %v241_v21 = vmul.f32 %v837_v11, %v225_v9  ;;  %v249_v22 = vmul.f32 %v832_v10, %v225_v9  ;;  %v250_v23 = vmul.f32 %v837_v11, %v216_v8  ;;  %229 = vst.msk [vmem:[#allocation4 + $0x2] sm:$0x1] %vm164_vm5, %v216_v8 }
  0xad   :  { %234 = vst.msk [vmem:[#allocation5 + $0x2] sm:$0x1] %vm164_vm5, %v225_v9  ;;  %v227_v27 = vrot.slane %v216_v8, 1  ;;  %v232_v28 = vrot.slane %v225_v9, 1  ;;  %v335_v8 = vld [vmem:[#allocation5 + $0xe] sm:$0x1]  ;;  %v310_v9 = vsel %vm148_vm4, %v309_v57, %v300_v59  ;;  %702 = vmatpush.msk.msrb.mxu2 %vm586_vm6, %v578_v4 }
  0xae   :  { %v242_v29 = vsub.f32 %v240_v20, %v241_v21  ;;  %v251_v30 = vadd.f32 %v250_v23, %v249_v22  ;;  %v350_v16 = vrot.slane %v335_v8, 7 }
  0xaf   :  { %230 = vst.msk [vmem:[#allocation4 + $0xa] sm:$0x1] %vm164_vm5, %v227_v27  ;;  %603 = vmatpush.msrb.mxu2 %v577_v5 }
  0xb0   :  { %v248_v36 = vadd.f32 %v246_v34, %v242_v29  ;;  %v257_v37 = vadd.f32 %v255_v35, %v251_v30  ;;  %235 = vst.msk [vmem:[#allocation5 + $0xa] sm:$0x1] %vm164_vm5, %v232_v28  ;;  %v367_v29 = vld [vmem:[#allocation5 + $0xf] sm:$0x1]  ;;  %v342_v30 = vsel %vm148_vm4, %v341_v15, %v332_v18  ;;  %v351_v31 = vsel %vm148_vm4, %v350_v16, %v334_v26  ;;  %v616_v18 = vld [vmem:[%s1023_s11 + $0x8] sm:$0xff] }
  0xb1   :  { %v373_v34 = vrot.slane %v365_v25, 7  ;;  %v382_v35 = vrot.slane %v367_v29, 7 }
  0xb2   :  { %v272_v41 = vmul.f32 %v832_v10, %v248_v36  ;;  %v273_v42 = vmul.f32 %v837_v11, %v257_v37  ;;  %v281_v43 = vmul.f32 %v832_v10, %v257_v37  ;;  %v282_v44 = vmul.f32 %v837_v11, %v248_v36  ;;  %261 = vst.msk [vmem:[#allocation4 + $0x3] sm:$0x1] %vm164_vm5, %v248_v36 }
  0xb3   :  { %266 = vst.msk [vmem:[#allocation5 + $0x3] sm:$0x1] %vm164_vm5, %v257_v37  ;;  %v259_v45 = vrot.slane %v248_v36, 1  ;;  %v264_v46 = vrot.slane %v257_v37, 1  ;;  %v364_v36 = vld [vmem:[#allocation4 + $0x7] sm:$0x1] }
  0xb4   :  { %v274_v49 = vsub.f32 %v272_v41, %v273_v42  ;;  %v283_v50 = vadd.f32 %v282_v44, %v281_v43  ;;  %v366_v43 = vld [vmem:[#allocation5 + $0x7] sm:$0x1] }
  0xb5   :  { %262 = vst.msk [vmem:[#allocation4 + $0xb] sm:$0x1] %vm164_vm5, %v259_v45  ;;  %v383_v47 = vsel %vm148_vm4, %v382_v35, %v366_v43 }
  0xb6   :  { %v280_v55 = vadd.f32 %v278_v52, %v274_v49  ;;  %v289_v56 = vadd.f32 %v287_v53, %v283_v50  ;;  %267 = vst.msk [vmem:[#allocation5 + $0xb] sm:$0x1] %vm164_vm5, %v264_v46  ;;  %v374_v46 = vsel %vm148_vm4, %v373_v34, %v364_v36 }
  0xb8   :  { %v304_v60 = vmul.f32 %v832_v10, %v280_v55  ;;  %v305_v61 = vmul.f32 %v837_v11, %v289_v56  ;;  %v313_v62 = vmul.f32 %v832_v10, %v289_v56  ;;  %v314_v63 = vmul.f32 %v837_v11, %v280_v55  ;;  %293 = vst.msk [vmem:[#allocation4 + $0x4] sm:$0x1] %vm164_vm5, %v280_v55 }
  0xb9   :  { %298 = vst.msk [vmem:[#allocation5 + $0x4] sm:$0x1] %vm164_vm5, %v289_v56  ;;  %v291_v0 = vrot.slane %v280_v55, 1  ;;  %v296_v2 = vrot.slane %v289_v56, 1 }
  0xba   :  { %v306_v6 = vsub.f32 %v304_v60, %v305_v61  ;;  %v315_v7 = vadd.f32 %v314_v63, %v313_v62 }
  0xbb   :  { %294 = vst.msk [vmem:[#allocation4 + $0xc] sm:$0x1] %vm164_vm5, %v291_v0 }
  0xbc   :  { %v312_v13 = vadd.f32 %v310_v9, %v306_v6  ;;  %v321_v14 = vadd.f32 %v319_v12, %v315_v7  ;;  %299 = vst.msk [vmem:[#allocation5 + $0xc] sm:$0x1] %vm164_vm5, %v296_v2  ;;  %v576_v6 = vld [vmem:[%s1021_s10 + $0x8] sm:$0xff]  ;;  %v575_v7 = vld [vmem:[%s1021_s10] sm:$0xff] }
  0xbd   :  { %604 = vmatpush.msrb.mxu2 %v576_v6  ;;  %v619_v12 = vld [vmem:[%s1022_s12] sm:$0xf] }
  0xbe   :  { %v336_v19 = vmul.f32 %v832_v10, %v312_v13  ;;  %v337_v20 = vmul.f32 %v837_v11, %v321_v14  ;;  %v345_v21 = vmul.f32 %v832_v10, %v321_v14  ;;  %v346_v22 = vmul.f32 %v837_v11, %v312_v13  ;;  %325 = vst.msk [vmem:[#allocation4 + $0x5] sm:$0x1] %vm164_vm5, %v312_v13 }
  0xbf   :  { %330 = vst.msk [vmem:[#allocation5 + $0x5] sm:$0x1] %vm164_vm5, %v321_v14  ;;  %v323_v23 = vrot.slane %v312_v13, 1  ;;  %v328_v24 = vrot.slane %v321_v14, 1  ;;  %605 = vmatpush.msrb.mxu2 %v575_v7  ;;  %v618_v13 = vld [vmem:[%s1023_s11 + $0x18] sm:$0x3f]  ;;  %705 = vmatpush.msk.msrb.mxu3 %vm62_vm0, %v619_v12 }
  0xc0   :  { %v338_v27 = vsub.f32 %v336_v19, %v337_v20  ;;  %v347_v28 = vadd.f32 %v346_v22, %v345_v21  ;;  %v617_v14 = vld [vmem:[%s1023_s11 + $0x10] sm:$0xff]  ;;  %708 = vmatpush.msk.msra.mxu0 %vm586_vm6, %v618_v13  ;;  %v615_v20 = vld [vmem:[%s1023_s11] sm:$0xff] }
  0xc1   :  { %326 = vst.msk [vmem:[#allocation4 + $0xd] sm:$0x1] %vm164_vm5, %v323_v23 }
  0xc2   :  { %v344_v32 = vadd.f32 %v342_v30, %v338_v27  ;;  %v353_v33 = vadd.f32 %v351_v31, %v347_v28  ;;  %331 = vst.msk [vmem:[#allocation5 + $0xd] sm:$0x1] %vm164_vm5, %v328_v24  ;;  %668 = vmatpush.msra.mxu0 %v617_v14 }
  0xc4   :  { %v377_v37 = vmul.f32 %v832_v10, %v353_v33  ;;  %v378_v38 = vmul.f32 %v837_v11, %v344_v32  ;;  %357 = vst.msk [vmem:[#allocation4 + $0x6] sm:$0x1] %vm164_vm5, %v344_v32  ;;  %v368_v39 = vmul.f32 %v832_v10, %v344_v32  ;;  %v369_v40 = vmul.f32 %v837_v11, %v353_v33 }
  0xc5   :  { %362 = vst.msk [vmem:[#allocation5 + $0x6] sm:$0x1] %vm164_vm5, %v353_v33  ;;  %v355_v41 = vrot.slane %v344_v32, 1  ;;  %v360_v42 = vrot.slane %v353_v33, 1  ;;  %669 = vmatpush.msra.mxu0 %v616_v18 }
  0xc6   :  { %v379_v44 = vadd.f32 %v378_v38, %v377_v37  ;;  %v370_v45 = vsub.f32 %v368_v39, %v369_v40 }
  0xc7   :  { %358 = vst.msk [vmem:[#allocation4 + $0xe] sm:$0x1] %vm164_vm5, %v355_v41  ;;  %670 = vmatpush.msra.mxu0 %v615_v20 }
  0xc8   :  { %v385_v48 = vadd.f32 %v383_v47, %v379_v44  ;;  %v376_v49 = vadd.f32 %v374_v46, %v370_v45  ;;  %363 = vst.msk [vmem:[#allocation5 + $0xe] sm:$0x1] %vm164_vm5, %v360_v42 }
  0xca   :  { %398 = vst.msk [vmem:[#allocation3] sm:$0x3] %vm48_vm2, %v385_v48  ;;  %v387_v10 = vrot.slane %v376_v49, 1  ;;  %v392_v11 = vrot.slane %v385_v48, 1 }
  0xcb   :  { %389 = vst.msk [vmem:[#allocation4 + $0x7] sm:$0x1] %vm164_vm5, %v376_v49 }
  0xcc   :  { %397 = vst.msk [vmem:[#allocation2] sm:$0x3] %vm48_vm2, %v376_v49 }
  0xcd   :  { %394 = vst.msk [vmem:[#allocation5 + $0x7] sm:$0x1] %vm164_vm5, %v385_v48 }
  0xce   :  { %390 = vst.msk [vmem:[#allocation4 + $0xf] sm:$0x1] %vm164_vm5, %v387_v10 }
  0xcf   :  { %395 = vst.msk [vmem:[#allocation5 + $0xf] sm:$0x1] %vm164_vm5, %v392_v11 }
  0xd2   :  { %v399_v50 = vld [vmem:[#allocation4] sm:$0xff] }
  0xd3   :  { %690 = vmatmul.msk.f32.vlgmr.msra.gmra.mxu2 %vm123_vm3, %v399_v50 }
  0xd4   :  { %v401_v51 = vld [vmem:[#allocation5] sm:$0xff] }
  0xd5   :  { %692 = vmatmul.msk.f32.vlgmr.msra.gmra.mxu3 %vm123_vm3, %v401_v51  ;;  %v400_v52 = vld [vmem:[#allocation4 + $0x8] sm:$0xff] }
  0xd6   :  { %v402_v53 = vld [vmem:[#allocation5 + $0x8] sm:$0xff] }
  0xdb   :  { %691 = vmatmul.msk.f32.gmra.mxu2 %vm123_vm3, %v400_v52 }
  0xdd   :  { %693 = vmatmul.msk.f32.gmra.mxu3 %vm123_vm3, %v402_v53 }
  0xe5   :  { %706 = vmatmul.msk.f32.vlgmr.msrb.gmra.mxu3 %vm55_vm1, %v811_v3 }
  0xed   :  { %707 = vmatmul.msk.f32.gmra.mxu3 %vm55_vm1, %v801_v1 }
 0x10c   :  { %v492_v56 = vpop.f32.mrf.mxu0 }
 0x114   :  { %v495_v63 = vpop.f32.mrf.mxu0 }
 0x156   :  { %v430_v54 = vpop.f32.mrf.mxu2 }
 0x158   :  { %v463_v55 = vpop.f32.mrf.mxu3 }
 0x159   :  { %v469_v57 = vsub.f32 %v430_v54, %v463_v55 }
 0x15b   :  { %v498_v58 = vmul.f32 2.0, %v469_v57 }
 0x15d   :  { %v500_v59 = vadd.f32 %v498_v58, %v492_v56 }
 0x15e   :  { %v433_v60 = vpop.f32.mrf.mxu2 }
 0x15f   :  { %698 = vmatmul.msk.f32.vlgmr.msra.gmra.mxu1 %vm55_vm1, %v500_v59 }
 0x160   :  { %v466_v61 = vpop.f32.mrf.mxu3 }
 0x161   :  { %v470_v62 = vsub.f32 %v433_v60, %v466_v61 }
 0x163   :  { %v499_v0 = vmul.f32 2.0, %v470_v62 }
 0x165   :  { %v501_v2 = vadd.f32 %v499_v0, %v495_v63 }
 0x167   :  { %699 = vmatmul.msk.f32.gmra.mxu1 %vm55_vm1, %v501_v2 }
 0x168   :  { %v640_v47 = vpop.f32.mrf.mxu3 }
 0x170   :  { %v643_v10 = vpop.f32.mrf.mxu3 }
 0x1dc   :  { %v529_v8 = vpop.f32.mrf.mxu1 }
 0x1dd   :  { %v700_v9 = vmul.f32 -1.442695, %v529_v8 }
 0x1df   :  { %716 = vpow2.f32 %v700_v9 }
 0x1e4   :  { %v532_v15 = vpop.f32.mrf.mxu1 }
 0x1e5   :  { %v717_v16 = vpop.eup %716  ;;  %v701_v17 = vmul.f32 -1.442695, %v532_v15 }
 0x1e6   :  { %v541_v19 = vadd.f32 1.0, %v717_v16 }
 0x1e7   :  { %718 = vpow2.f32 %v701_v17 }
 0x1e8   :  { %720 = vrcp.f32 %v541_v19  ;;  %v554_v3 = vand.u32 2147483648, %v541_v19  ;;  %v552_v27 = vand.u32 2147483647, %v541_v19  ;;  %vm548_vm8 = vweird.f32 %v541_v19 }
 0x1ea   :  { %v555_v30 = vor.u32 1.1754944e-38, %v554_v3  ;;  %vm553_vm10 = vcmp.eq.f32.partialorder %v552_v27, 8.507059e+37 }
 0x1ed   :  { %v719_v21 = vpop.eup %718 }
 0x1ee   :  { %v721_v22 = vpop.eup %720  ;;  %v542_v23 = vadd.f32 1.0, %v719_v21 }
 0x1ef   :  { %v544_v24 = vmul.f32 %v721_v22, %v541_v19  ;;  %vm549_vm7 = vweird.f32 %v721_v22 }
 0x1f0   :  { %722 = vrcp.f32 %v542_v23  ;;  %vm550_vm9 = vmor %vm548_vm8, %vm549_vm7  ;;  %v569_v35 = vand.u32 2147483648, %v542_v23  ;;  %v567_v37 = vand.u32 2147483647, %v542_v23  ;;  %vm563_vm13 = vweird.f32 %v542_v23 }
 0x1f1   :  { %v545_v25 = vsub.f32 1.0, %v544_v24 }
 0x1f2   :  { %v570_v39 = vor.u32 1.1754944e-38, %v569_v35  ;;  %vm568_vm15 = vcmp.eq.f32.partialorder %v567_v37, 8.507059e+37 }
 0x1f3   :  { %v546_v26 = vmul.f32 %v721_v22, %v545_v25 }
 0x1f5   :  { %v547_v28 = vadd.f32 %v721_v22, %v546_v26 }
 0x1f6   :  { %v723_v29 = vpop.eup %722 }
 0x1f7   :  { %v551_v31 = vsel %vm550_vm9, %v721_v22, %v547_v28  ;;  %v559_v32 = vmul.f32 %v723_v29, %v542_v23  ;;  %vm564_vm12 = vweird.f32 %v723_v29 }
 0x1f8   :  { %v556_v33 = vsel %vm553_vm10, %v555_v30, %v551_v31  ;;  %vm565_vm14 = vmor %vm563_vm13, %vm564_vm12 }
 0x1f9   :  { %v573_v1 = vmul.f32 %v556_v33, %v529_v8  ;;  %v560_v34 = vsub.f32 1.0, %v559_v32 }
 0x1fb   :  { %v561_v36 = vmul.f32 %v723_v29, %v560_v34  ;;  %703 = vmatmul.msk.f32.vlgmr.msrb.gmra.mxu2 %vm579_vm11, %v573_v1 }
 0x1fd   :  { %v562_v38 = vadd.f32 %v723_v29, %v561_v36 }
 0x1ff   :  { %v566_v40 = vsel %vm565_vm14, %v723_v29, %v562_v38 }
 0x200   :  { %v571_v41 = vsel %vm568_vm15, %v570_v39, %v566_v40 }
 0x201   :  { %v574_v42 = vmul.f32 %v571_v41, %v532_v15 }
 0x203   :  { %704 = vmatmul.msk.f32.gmra.mxu2 %vm579_vm11, %v574_v42 }
 0x27e   :  { %v607_v43 = vpop.f32.mrf.mxu2 }
 0x27f   :  { %v613_v44 = vmax.f32 %v607_v43, 0.0 }
 0x281   :  { %709 = vmatmul.msk.f32.vlgmr.msra.gmra.mxu0 %vm579_vm11, %v613_v44 }
 0x286   :  { %v610_v45 = vpop.f32.mrf.mxu2 }
 0x287   :  { %v614_v46 = vmax.f32 %v610_v45, 0.0 }
 0x289   :  { %710 = vmatmul.msk.f32.gmra.mxu0 %vm579_vm11, %v614_v46 }
 0x2fe   :  { %v672_v48 = vpop.f32.mrf.mxu0 }
 0x2ff   :  { %v673_v49 = vadd.f32 %v672_v48, %v640_v47 }
 0x301   :  { %678 = vst.msk [vmem:[%s1024_s13] sm:$0xff] %vm55_vm1, %v673_v49 }
 0x306   :  { %v675_v11 = vpop.f32.mrf.mxu0 }
 0x307   :  { %v676_v50 = vadd.f32 %v675_v11, %v643_v10 }
 0x309   :  { %679 = vst.msk [vmem:[%s1024_s13 + $0x8] sm:$0xff] %vm55_vm1, %v676_v50 }

</bundles_post_ra>
